<compile_context>
chip_gen: v7x
topology: tpu7x:2x2x1
jax: 0.10.0
libtpu: 0.0.40
codegen_flags: <defaults>
</compile_context>

<pallas_src>
import jax
import jax.numpy as jnp
from jax.experimental import pallas as pl
from jax.experimental.pallas import tpu as pltpu

# ---------------------------------------------------------------------------
# Model hyper-parameters (small, consistent with the PyTorch module)
# ---------------------------------------------------------------------------
VOCAB_SIZE = 128
EMBEDDING_DIM = 16
CONTEXT_SIZE = 8                      # -> fc1 in_features = 16 * 8 = 128
HIDDEN_DIM = 32
HIDDEN_PAD = 128                      # lane-dense hidden (zero-pad 32 -> 128)
K_FOLDED = CONTEXT_SIZE * VOCAB_SIZE  # 1024: folded (gather+fc1) contraction dim
BN_EPS = 1e-5

BATCH = 32                            # demo batch
TB = 8                                # rows per grid tile (sublane-aligned)


# ---------------------------------------------------------------------------
# Fused kernel: one-hot gather (+fc1+BN folded, single K=1024 dot) -> ReLU
#               -> fc2 -> log_softmax
# ---------------------------------------------------------------------------
def kernel(ids_ref, p_ref, bias_ref, w2_ref, out_ref):
    ids = ids_ref[...]                                            # (TB, C) int32
    col = jax.lax.broadcasted_iota(jnp.int32, (TB, VOCAB_SIZE), 1)

    # Build the (TB, C*V) one-hot by concatenating per-context (TB, V) one-hots
    # along the lane axis (NOT via a (TB, C, V) reshape).
    onehots = [
        (col == ids[:, c:c + 1]).astype(jnp.float32)              # (TB, V)
        for c in range(CONTEXT_SIZE)
    ]
    onehot = jnp.concatenate(onehots, axis=-1)                    # (TB, 1024)

    # Fused embedding lookup + fc1 (+ folded BatchNorm) as ONE K=1024 MXU dot:
    #   h[b] = b1' + sum_c P[c][ ids[b, c] ]
    h = jnp.dot(onehot, p_ref[...],
                preferred_element_type=jnp.float32)               # (TB, H_pad)
    h = h + bias_ref[0:1, :]

    # activation_function = ReLU ; dropout1 is identity in eval mode.
    # TODO(synk): train-mode dropout (pltpu.prng_*) / BN batch stats not implemented.
    h = jnp.maximum(h, 0.0)

    # fc2: (TB, H_pad) @ (H_pad, V) + b2   (padded rows of w2 are zero)
    logits = jnp.dot(h, w2_ref[...], preferred_element_type=jnp.float32)
    logits = logits + bias_ref[1:2, :]

    # log_softmax over dim=1 (vocab axis)
    m = jnp.max(logits, axis=-1, keepdims=True)
    shifted = logits - m
    lse = jnp.log(jnp.sum(jnp.exp(shifted), axis=-1, keepdims=True))
    out_ref[...] = shifted - lse


# ---------------------------------------------------------------------------
# Host-side (one-time, f32, HIGHEST precision) parameter folding
# ---------------------------------------------------------------------------
def prepare_params(params):
    """Fold BatchNorm into fc1 and pre-project the embedding table through fc1."""
    emb_table, w1, b1, gamma, beta, run_mean, run_var, w2, b2 = params

    # BatchNorm(eval) fold:  y = (x - mean) * (gamma / sqrt(var+eps)) + beta
    scale = gamma / jnp.sqrt(run_var + BN_EPS)                     # (1, H)
    w1f = w1 * scale                                               # (C*E, H)
    b1f = (b1 - run_mean) * scale + beta                           # (1, H)

    # P[c] = emb_table @ W1'[c*E:(c+1)*E, :]  -> (C, V, H), padded lane-dense,
    # then flattened to (C*V, H_pad) so the kernel does a single K=1024 dot.
    w1f = w1f.reshape(CONTEXT_SIZE, EMBEDDING_DIM, HIDDEN_DIM)
    p = jnp.einsum('ve,ceh->cvh', emb_table, w1f,
                   precision=jax.lax.Precision.HIGHEST)            # (C, V, H)
    p = jnp.pad(p, ((0, 0), (0, 0), (0, HIDDEN_PAD - HIDDEN_DIM)))
    p = p.reshape(K_FOLDED, HIDDEN_PAD)                            # (1024, 128)

    b1f = jnp.pad(b1f, ((0, 0), (0, HIDDEN_PAD - HIDDEN_DIM)))     # (1, 128)
    w2p = jnp.pad(w2, ((0, HIDDEN_PAD - HIDDEN_DIM), (0, 0)))      # (128, V)
    biases = jnp.concatenate([b1f, b2], axis=0)                    # (2, 128)
    return p, biases, w2p


def next_word_mlp_forward(token_ids, folded):
    """token_ids: (B, CONTEXT_SIZE) int32 -> log-probs (B, VOCAB_SIZE) f32."""
    p, biases, w2p = folded
    B = token_ids.shape[0]

    # Pad the batch to a multiple of TB (padded rows are computed & discarded).
    n_tiles = pl.cdiv(B, TB)
    b_pad = n_tiles * TB
    if b_pad != B:
        token_ids = jnp.pad(token_ids, ((0, b_pad - B), (0, 0)))

    resident = lambda shape: pl.BlockSpec(shape, lambda i: (0,) * len(shape))

    out = pl.pallas_call(
        kernel,
        out_shape=jax.ShapeDtypeStruct((b_pad, VOCAB_SIZE), jnp.float32),
        grid=(n_tiles,),
        in_specs=[
            pl.BlockSpec((TB, CONTEXT_SIZE), lambda i: (i, 0)),    # token ids
            resident((K_FOLDED, HIDDEN_PAD)),                      # P (emb@fc1, BN-folded)
            resident((2, HIDDEN_PAD)),                             # [b1'; b2]
            resident((HIDDEN_PAD, VOCAB_SIZE)),                    # w2 (zero-padded rows)
        ],
        out_specs=pl.BlockSpec((TB, VOCAB_SIZE), lambda i: (i, 0)),
        compiler_params=pltpu.CompilerParams(
            dimension_semantics=("parallel",)),                    # v7x: shard tiles over 2 TCs
    )(token_ids, p, biases, w2p)

    return out[:B] if b_pad != B else out


# ---------------------------------------------------------------------------
# Deterministic parameter initialization (shapes dictated by __init__)
# ---------------------------------------------------------------------------
def init_params(key):
    k_emb, k_w1, k_b1, k_w2, k_b2, k_mean, k_var = jax.random.split(key, 7)
    in_dim = CONTEXT_SIZE * EMBEDDING_DIM

    emb_table = jax.random.normal(k_emb, (VOCAB_SIZE, EMBEDDING_DIM), jnp.float32)

    w1 = jax.random.normal(k_w1, (in_dim, HIDDEN_DIM), jnp.float32) * 0.05
    b1 = jax.random.normal(k_b1, (1, HIDDEN_DIM), jnp.float32) * 0.01

    gamma = jnp.ones((1, HIDDEN_DIM), jnp.float32)
    beta = jnp.zeros((1, HIDDEN_DIM), jnp.float32)
    run_mean = jax.random.normal(k_mean, (1, HIDDEN_DIM), jnp.float32) * 0.1
    run_var = jnp.abs(jax.random.normal(k_var, (1, HIDDEN_DIM), jnp.float32)) + 0.5

    w2 = jax.random.normal(k_w2, (HIDDEN_DIM, VOCAB_SIZE), jnp.float32) * 0.05
    b2 = jax.random.normal(k_b2, (1, VOCAB_SIZE), jnp.float32) * 0.01

    return (emb_table, w1, b1, gamma, beta, run_mean, run_var, w2, b2)


def reference_forward(token_ids, params):
    """Pure-JAX reference mirroring the PyTorch module (eval mode)."""
    emb_table, w1, b1, gamma, beta, run_mean, run_var, w2, b2 = params
    x = emb_table[token_ids].reshape(token_ids.shape[0], -1)
    h = x @ w1 + b1
    h = (h - run_mean) * (gamma / jnp.sqrt(run_var + BN_EPS)) + beta
    h = jnp.maximum(h, 0.0)
    logits = h @ w2 + b2
    return jax.nn.log_softmax(logits, axis=1)


if __name__ == "__main__":
    key = jax.random.PRNGKey(0)
    k_params, k_tok = jax.random.split(key)

    params = init_params(k_params)
    token_ids = jax.random.randint(k_tok, (BATCH, CONTEXT_SIZE), 0, VOCAB_SIZE,
                                   dtype=jnp.int32)

    folded = jax.tree_util.tree_map(jax.block_until_ready, prepare_params(params))

    out = next_word_mlp_forward(token_ids, folded)
    out = jax.block_until_ready(out)

    ref = reference_forward(token_ids, params)
    assert out.shape == (BATCH, VOCAB_SIZE)
    assert jnp.allclose(out, ref, atol=1e-4, rtol=1e-4), "mismatch vs reference"

    print("KERNEL_OK")
</pallas_src>

<mosaic_0001>
module attributes {stable_mosaic.version = 11 : i64} {
  func.func @kernel(%arg0: i32, %arg1: memref<8x8xi32, #tpu.memory_space<vmem>>, %arg2: memref<1024x128xf32, #tpu.memory_space<vmem>>, %arg3: memref<2x128xf32, #tpu.memory_space<vmem>>, %arg4: memref<128x128xf32, #tpu.memory_space<vmem>>, %arg5: memref<8x128xf32, #tpu.memory_space<vmem>>) attributes {dimension_semantics = [#tpu.dimension_semantics<parallel>], iteration_bounds = array<i64: 4>, scalar_prefetch = 0 : i64, scratch_operands = 0 : i64, tpu.core_type = #tpu.core_type<tc>, window_params = [{transform_indices = @transform_0, window_bounds = array<i64: 8, 8>}, {pipeline_mode = #tpu.pipeline_mode<synchronous>, transform_indices = @transform_1, window_bounds = array<i64: 1024, 128>}, {pipeline_mode = #tpu.pipeline_mode<synchronous>, transform_indices = @transform_2, window_bounds = array<i64: 2, 128>}, {pipeline_mode = #tpu.pipeline_mode<synchronous>, transform_indices = @transform_3, window_bounds = array<i64: 128, 128>}, {transform_indices = @transform_4, window_bounds = array<i64: 8, 128>}]} {
    %c0 = arith.constant 0 : index
    %c0_0 = arith.constant 0 : index
    %0 = vector.load %arg1[%c0, %c0_0] : memref<8x8xi32, #tpu.memory_space<vmem>>, vector<8x8xi32>
    %1 = tpu.iota {dimensions = array<i32: 1>} : vector<8x128xi32>
    %2 = vector.extract_strided_slice %0 {offsets = [0, 0], sizes = [8, 1], strides = [1, 1]} : vector<8x8xi32> to vector<8x1xi32>
    %3 = vector.broadcast %2 : vector<8x1xi32> to vector<8x128xi32>
    %4 = arith.cmpi eq, %1, %3 : vector<8x128xi32>
    %5 = arith.extui %4 : vector<8x128xi1> to vector<8x128xi32>
    %6 = arith.sitofp %5 : vector<8x128xi32> to vector<8x128xf32>
    %7 = vector.extract_strided_slice %0 {offsets = [0, 1], sizes = [8, 1], strides = [1, 1]} : vector<8x8xi32> to vector<8x1xi32>
    %8 = vector.broadcast %7 : vector<8x1xi32> to vector<8x128xi32>
    %9 = arith.cmpi eq, %1, %8 : vector<8x128xi32>
    %10 = arith.extui %9 : vector<8x128xi1> to vector<8x128xi32>
    %11 = arith.sitofp %10 : vector<8x128xi32> to vector<8x128xf32>
    %12 = vector.extract_strided_slice %0 {offsets = [0, 2], sizes = [8, 1], strides = [1, 1]} : vector<8x8xi32> to vector<8x1xi32>
    %13 = vector.broadcast %12 : vector<8x1xi32> to vector<8x128xi32>
    %14 = arith.cmpi eq, %1, %13 : vector<8x128xi32>
    %15 = arith.extui %14 : vector<8x128xi1> to vector<8x128xi32>
    %16 = arith.sitofp %15 : vector<8x128xi32> to vector<8x128xf32>
    %17 = vector.extract_strided_slice %0 {offsets = [0, 3], sizes = [8, 1], strides = [1, 1]} : vector<8x8xi32> to vector<8x1xi32>
    %18 = vector.broadcast %17 : vector<8x1xi32> to vector<8x128xi32>
    %19 = arith.cmpi eq, %1, %18 : vector<8x128xi32>
    %20 = arith.extui %19 : vector<8x128xi1> to vector<8x128xi32>
    %21 = arith.sitofp %20 : vector<8x128xi32> to vector<8x128xf32>
    %22 = vector.extract_strided_slice %0 {offsets = [0, 4], sizes = [8, 1], strides = [1, 1]} : vector<8x8xi32> to vector<8x1xi32>
    %23 = vector.broadcast %22 : vector<8x1xi32> to vector<8x128xi32>
    %24 = arith.cmpi eq, %1, %23 : vector<8x128xi32>
    %25 = arith.extui %24 : vector<8x128xi1> to vector<8x128xi32>
    %26 = arith.sitofp %25 : vector<8x128xi32> to vector<8x128xf32>
    %27 = vector.extract_strided_slice %0 {offsets = [0, 5], sizes = [8, 1], strides = [1, 1]} : vector<8x8xi32> to vector<8x1xi32>
    %28 = vector.broadcast %27 : vector<8x1xi32> to vector<8x128xi32>
    %29 = arith.cmpi eq, %1, %28 : vector<8x128xi32>
    %30 = arith.extui %29 : vector<8x128xi1> to vector<8x128xi32>
    %31 = arith.sitofp %30 : vector<8x128xi32> to vector<8x128xf32>
    %32 = vector.extract_strided_slice %0 {offsets = [0, 6], sizes = [8, 1], strides = [1, 1]} : vector<8x8xi32> to vector<8x1xi32>
    %33 = vector.broadcast %32 : vector<8x1xi32> to vector<8x128xi32>
    %34 = arith.cmpi eq, %1, %33 : vector<8x128xi32>
    %35 = arith.extui %34 : vector<8x128xi1> to vector<8x128xi32>
    %36 = arith.sitofp %35 : vector<8x128xi32> to vector<8x128xf32>
    %37 = vector.extract_strided_slice %0 {offsets = [0, 7], sizes = [8, 1], strides = [1, 1]} : vector<8x8xi32> to vector<8x1xi32>
    %38 = vector.broadcast %37 : vector<8x1xi32> to vector<8x128xi32>
    %39 = arith.cmpi eq, %1, %38 : vector<8x128xi32>
    %40 = arith.extui %39 : vector<8x128xi1> to vector<8x128xi32>
    %41 = arith.sitofp %40 : vector<8x128xi32> to vector<8x128xf32>
    %42 = tpu.concatenate %6, %11, %16, %21, %26, %31, %36, %41 in 1 : vector<8x128xf32>, vector<8x128xf32>, vector<8x128xf32>, vector<8x128xf32>, vector<8x128xf32>, vector<8x128xf32>, vector<8x128xf32>, vector<8x128xf32> -> vector<8x1024xf32>
    %c0_1 = arith.constant 0 : index
    %c0_2 = arith.constant 0 : index
    %43 = vector.load %arg2[%c0_1, %c0_2] : memref<1024x128xf32, #tpu.memory_space<vmem>>, vector<1024x128xf32>
    %cst = arith.constant dense<0.000000e+00> : vector<8x128xf32>
    %44 = tpu.matmul %42, %43, %cst {dimension_numbers = #tpu.dot_dimension_numbers<[1], [0], [0], [1], [0, 0, 1, 1], [], []>} : vector<8x1024xf32>, vector<1024x128xf32>, vector<8x128xf32> -> vector<8x128xf32>
    %c0_3 = arith.constant 0 : index
    %c0_4 = arith.constant 0 : index
    %45 = vector.load %arg3[%c0_3, %c0_4] : memref<2x128xf32, #tpu.memory_space<vmem>>, vector<1x128xf32>
    %46 = vector.broadcast %45 : vector<1x128xf32> to vector<8x128xf32>
    %47 = arith.addf %44, %46 : vector<8x128xf32>
    %cst_5 = arith.constant 0.000000e+00 : f32
    %48 = vector.broadcast %cst_5 : f32 to vector<8x128xf32>
    %49 = arith.maximumf %47, %48 : vector<8x128xf32>
    %c0_6 = arith.constant 0 : index
    %c0_7 = arith.constant 0 : index
    %50 = vector.load %arg4[%c0_6, %c0_7] : memref<128x128xf32, #tpu.memory_space<vmem>>, vector<128x128xf32>
    %cst_8 = arith.constant dense<0.000000e+00> : vector<8x128xf32>
    %51 = tpu.matmul %49, %50, %cst_8 {dimension_numbers = #tpu.dot_dimension_numbers<[1], [0], [0], [1], [0, 0, 1, 1], [], []>} : vector<8x128xf32>, vector<128x128xf32>, vector<8x128xf32> -> vector<8x128xf32>
    %c1 = arith.constant 1 : index
    %c0_9 = arith.constant 0 : index
    %52 = vector.load %arg3[%c1, %c0_9] : memref<2x128xf32, #tpu.memory_space<vmem>>, vector<1x128xf32>
    %53 = vector.broadcast %52 : vector<1x128xf32> to vector<8x128xf32>
    %54 = arith.addf %51, %53 : vector<8x128xf32>
    %cst_10 = arith.constant dense<0xFF800000> : vector<8xf32>
    %55 = vector.multi_reduction <maximumf>, %54, %cst_10 [1] : vector<8x128xf32> to vector<8xf32>
    %56 = vector.shape_cast %55 : vector<8xf32> to vector<8x1xf32>
    %57 = vector.broadcast %56 : vector<8x1xf32> to vector<8x128xf32>
    %58 = arith.subf %54, %57 : vector<8x128xf32>
    %59 = math.exp %58 : vector<8x128xf32>
    %cst_11 = arith.constant dense<0.000000e+00> : vector<8xf32>
    %60 = vector.multi_reduction <add>, %59, %cst_11 [1] : vector<8x128xf32> to vector<8xf32>
    %61 = vector.shape_cast %60 : vector<8xf32> to vector<8x1xf32>
    %62 = math.log %61 : vector<8x1xf32>
    %63 = vector.broadcast %62 : vector<8x1xf32> to vector<8x128xf32>
    %64 = arith.subf %58, %63 : vector<8x128xf32>
    %c0_12 = arith.constant 0 : index
    %c0_13 = arith.constant 0 : index
    %65 = vector.load %arg5[%c0_12, %c0_13] : memref<8x128xf32, #tpu.memory_space<vmem>>, vector<8x128xf32>
    tpu.vector_store %arg5[%c0_12, %c0_13], %64 {strides = array<i32>} : memref<8x128xf32, #tpu.memory_space<vmem>>, vector<8x128xf32>,
    return
  }
  func.func @transform_0(%arg0: i32) -> (i32, i32) {
    %c0_i32 = arith.constant 0 : i32
    %c0_i32_0 = arith.constant 0 : i32
    return %arg0, %c0_i32 : i32, i32
  }
  func.func @transform_1(%arg0: i32) -> (i32, i32) {
    %c0_i32 = arith.constant 0 : i32
    %c0_i32_0 = arith.constant 0 : i32
    %c0_i32_1 = arith.constant 0 : i32
    return %c0_i32, %c0_i32_0 : i32, i32
  }
  func.func @transform_2(%arg0: i32) -> (i32, i32) {
    %c0_i32 = arith.constant 0 : i32
    %c0_i32_0 = arith.constant 0 : i32
    %c0_i32_1 = arith.constant 0 : i32
    return %c0_i32, %c0_i32_0 : i32, i32
  }
  func.func @transform_3(%arg0: i32) -> (i32, i32) {
    %c0_i32 = arith.constant 0 : i32
    %c0_i32_0 = arith.constant 0 : i32
    %c0_i32_1 = arith.constant 0 : i32
    return %c0_i32, %c0_i32_0 : i32, i32
  }
  func.func @transform_4(%arg0: i32) -> (i32, i32) {
    %c0_i32 = arith.constant 0 : i32
    %c0_i32_0 = arith.constant 0 : i32
    return %arg0, %c0_i32 : i32, i32
  }
}

</mosaic_0001>

<bundles_post_ra>
// kernel: tpu_custom_call.1
= control target key start
LH: loop header
LB: loop body
LE: loop exit
PB: predicated region body
PF: predicated region fallthrough
CT: control target
= control target key end

     0   :  { %9 = vsyncpa [#allocation3], 0  ;;  %s1726_s0 = inlined_call_operand.vmem [shape: s32[32,8], index: 0, kind: input, shape index: {}]   ;;  %s1727_s1 = inlined_call_operand.hbm [shape: f32[1024,128], index: 1, kind: input, shape index: {}]   ;;  %s1728_s2 = inlined_call_operand.vmem [shape: f32[2,128], index: 2, kind: input, shape index: {}]   ;;  %s1729_s3 = inlined_call_operand.hbm [shape: f32[128,128], index: 3, kind: input, shape index: {}]   ;;  %s1730_s4 = inlined_call_operand.hbm [shape: f32[32,128], index: 4, kind: output, shape index: {}]  }
   0x1   :  { %10 = vsyncpa [#allocation6], 0 }
   0x2   :  { %11 = vsyncpa [#allocation4], 0 }
   0x3   :  { %13 = vsyncpa [#allocation4 + $0x1], 0  ;;  %s1518_s15 = smov 0   ;;  %s1520_s16 = smov 0  }
   0x4   :  { %s1522_s17 = smov 0   ;;  %s1524_s18 = smov 0  }
   0x5 LB: > { %s1539_s19 = sadd.s32 4294967295, %s1474_s18   ;;  %s885_s20 = sadd.s32 4294967294, %s1474_s18   ;;  %s1474_s18 = sphi %s1524_s18, %s1748_s18   ;;  %s1470_s17 = sphi %s1522_s17, %s1747_s17   ;;  %s1466_s16 = sphi %s1520_s16, %s1746_s16   ;;  %s1462_s15 = sphi %s1518_s15, %s1745_s15  }
   0x6   : > { %s1543_s21 = sadd.s32 1, %s1474_s18   ;;  %s115_s22 = sadd.s32 1, %s1470_s17 }
   0x7   : > { %s112_s23 = ssub.s32 %s1474_s18, %s1543_s21  ;;  %p125_p0 = scmp.ne.s32.totalorder %s1470_s17, %s1466_s16 }
   0x8   : > { %p113_p1 = scmp.eq.s32.totalorder %s112_s23, 0  ;;  %p126_p2 = scmp.eq.s32.totalorder %s1539_s19, 3 }
   0x9   : > { %p131_p3 = scmp.ne.s32.totalorder %s1466_s16, %s1462_s15  ;;  %p132_p4 = scmp.eq.s32.totalorder %s885_s20, 3 }
   0xa   : > { %s1554_s24 = scalar_select %p113_p1, %s1470_s17, %s115_s22  }
   0xb   : > { %p1556_p5 = por %p126_p2, %p125_p0  ;;  %p1560_p6 = por %p132_p4, %p131_p3 }
   0xc   : > { %p886_p7 = scmp.ge.s32.totalorder %s1474_s18, 1  ;;  %p139_p8 = scmp.lt.s32.totalorder %s1474_s18, 5 }
   0xd   : > { %s1734_s25 = scalar_select %p1556_p5, 1, 0 }
   0xe   : > { %s1735_s26 = scalar_select %p1560_p6, 1, 0 }
   0xf   : > { %p1731_p9 = scmp.eq.s32.totalorder %s1539_s19, 0  ;;  %p1567_p10 = pnand %p886_p7, %p139_p8 }
  0x10   : > { %s1476_s28 = smov [#allocation2]   ;;  %s1477_s5 = smov [#allocation5]  }
  0x11   : > { %s1736_s27 = scalar_select %p1567_p10, 1, 0 }
  0x12   : > { %s151_s29 = sshll.u32 %s1476_s28, 4  ;;  %p1271_p11 = pneg %p1567_p10  ;;  %s152_s29 = int_to_ptr.vmem [resolvable:$true] %s151_s29 }
  0x13   : > { %s167_s6 = sshll.u32 %s1477_s5, 4  ;;  %s1348_s9 = scalar_lea.hbm %s1727_s1, 16384  ;;  %s1579_s6 = int_to_ptr.vmem [resolvable:$true] %s167_s6 }
  0x14   : > { %p1575_p12 = pnand %p1731_p9, %p1271_p11  ;;  %p1349_p13 = scmp.ne.s32.totalorder %s1727_s1, %s1348_s9 }
  0x15   : > { %p1355_p3 = scmp.lt.u32.totalorder %s1348_s9, %s1727_s1 }
  0x16   : > { %p1350_p0 = pneg %p1575_p12 }
  0x18   : > { %p1351_p1 = pnand %p1350_p0, %p1349_p13 }
  0x1a   : > { %p1352_p2 = pneg %p1351_p1 }
  0x1c   : > { %p1357_p4 = pnand %p1355_p3, %p1352_p2 }
  0x1e   : > { %1360 = shalt.err (!%p1357_p4)
}
  0x1f   : > { %s1361_s14 = scalar_lea.vmem %s152_s29, 16384  ;;  %p1369_p9 = scmp.lt.s32.totalorder %s152_s29, %s152_s29 }
  0x20   : > { %p1362_p7 = scmp.ne.s32.totalorder %s152_s29, %s1361_s14  ;;  %p1370_p6 = scmp.lt.s32.totalorder %s1361_s14, %s1361_s14 }
  0x22   : > { %p1364_p8 = pnand %p1362_p7, %p1350_p0  ;;  %p1371_p5 = por %p1370_p6, %p1369_p9 }
  0x24   : > { %p1365_p11 = pneg %p1364_p8 }
  0x26   : > { %p1372_p10 = pnand %p1371_p5, %p1365_p11 }
  0x28   : > { %1375 = shalt.err (!%p1372_p10)
}
  0x29   : > { %s1478_s20 = smov 128   ;;  %s1479_s22 = smov 8  }
  0x2a   : > { %1274 = dma.hbm_to_vmem [thread:$0]  (!%p1575_p12), %s1727_s1, 16384, %s152_s29, [#allocation3], %s1478_s20, %s1478_s20, %s1479_s22  }
  0x2b   : > { %s1376_s8 = scalar_lea.hbm %s1729_s3, 2048 }
  0x2c   : > { %p1377_p13 = scmp.ne.s32.totalorder %s1729_s3, %s1376_s8  ;;  %p1383_p9 = scmp.lt.u32.totalorder %s1376_s8, %s1729_s3 }
  0x2e   : > { %p1379_p5 = pnand %p1377_p13, %p1350_p0 }
  0x30   : > { %p1380_p6 = pneg %p1379_p5 }
  0x32   : > { %p1385_p10 = pnand %p1383_p9, %p1380_p6 }
  0x34   : > { %1388 = shalt.err (!%p1385_p10)
}
  0x35   : > { %s1389_s29 = scalar_lea.vmem %s1579_s6, 2048  ;;  %p1397_p4 = scmp.lt.s32.totalorder %s1579_s6, %s1579_s6 }
  0x36   : > { %p1390_p1 = scmp.ne.s32.totalorder %s1579_s6, %s1389_s29  ;;  %p1398_p7 = scmp.lt.s32.totalorder %s1389_s29, %s1389_s29 }
  0x38   : > { %p1392_p2 = pnand %p1390_p1, %p1350_p0  ;;  %p1399_p8 = por %p1398_p7, %p1397_p4 }
  0x3a   : > { %p1393_p3 = pneg %p1392_p2 }
  0x3c   : > { %p1400_p11 = pnand %p1399_p8, %p1393_p3 }
  0x3e   : > { %1403 = shalt.err (!%p1400_p11)
}
  0x3f   : > { %1277 = dma.hbm_to_vmem [thread:$0]  (!%p1575_p12), %s1729_s3, 2048, %s1579_s6, [#allocation6], %s1478_s20, %s1478_s20, %s1479_s22  }
  0x40   : > { %p1738_p13 = scmp.ne.s32.totalorder %s1736_s27, 0 }
  0x41   : > { %p1739_p5 = scmp.eq.s32.totalorder (!%p1738_p13), %s1539_s19, 0 }
  0x42   : > { %190 = sbr.rel (%p1738_p13) target bundleno = 1014 (0x3f6), region = 36 }
  0x49   : > { %1449 = dma.done.wait (%p1739_p5), [#allocation3], 16384   ;;  %p1740_p0 = pmov %p1739_p5 }
  0x4b   : > { %1451 = vsyncadd (%p1740_p0), [#allocation3], 4294950912  ;;  %p1741_p6 = pmov %p1740_p0 }
  0x4c   : > { %p1742_p9 = pmov %p1740_p0 }
  0x4d   : > { %1453 = dma.done.wait (%p1741_p6), [#allocation6], 2048  }
  0x4e   : > { %1455 = vsyncadd (%p1742_p9), [#allocation6], 4294965248  ;;  %p219_p10 = scmp.lt.s32.totalorder %s1539_s19, 3  ;;  %v1480_v0 = vmov 1   ;;  %v1481_v1 = vmov 3   ;;  %v290_v3 = vld [vmem:[#allocation2 + $0x80] sm:$0xff] }
  0x4f   : > { %1335 = vset.pattern.permute.xlu0 %v1480_v0  ;;  %1337 = vset.pattern.permute.xlu1 %v1481_v1  ;;  %v291_v4 = vld [vmem:[#allocation2 + $0x88] sm:$0xff]  ;;  %v274_v6 = vld [vmem:[#allocation2] sm:$0xff]  ;;  %v292_v14 = vld [vmem:[#allocation2 + $0x90] sm:$0xff]  ;;  %v1482_v22 = vmov 0   ;;  %v1483_v23 = vmov 2   ;;  %v1484_v44 = vmov 5  }
  0x50   : > { %s220_s27 = scalar_select %p219_p10, %s1539_s19, 3  ;;  %v1109_v5 = vpack.c.bf16 %v291_v4, %v290_v3  ;;  %v275_v7 = vld [vmem:[#allocation2 + $0x8] sm:$0xff]  ;;  %v322_v8 = vld [vmem:[#allocation2 + $0x180] sm:$0xff]  ;;  %v293_v15 = vld [vmem:[#allocation2 + $0x98] sm:$0xff]  ;;  %v1485_v45 = vmov 4   ;;  %v1486_v60 = vmov 7  }
  0x51   : > { %v1111_v9 = vpack.c.bf16 %v275_v7, %v274_v6  ;;  %v323_v10 = vld [vmem:[#allocation2 + $0x188] sm:$0xff]  ;;  %v306_v11 = vld [vmem:[#allocation2 + $0x100] sm:$0xff]  ;;  %v276_v16 = vld [vmem:[#allocation2 + $0x10] sm:$0xff]  ;;  %v1113_v18 = vpack.c.bf16 %v293_v15, %v292_v14  ;;  %vm1490_vm8 = vmmov 0   ;;  %s216_s8 = sand.u32 1, %s1466_s16   ;;  %s914_s10 = sshll.u32 %s1539_s19, 7 }
  0x52   : > { %s894_s30 = sshll.u32 %s220_s27, 3  ;;  %v307_v12 = vld [vmem:[#allocation2 + $0x108] sm:$0xff]  ;;  %1110 = vmatprep.subr.bf16.mxu0 %v1109_v5  ;;  %v1141_v13 = vpack.c.bf16 %v323_v10, %v322_v8  ;;  %v277_v19 = vld [vmem:[#allocation2 + $0x18] sm:$0xff]  ;;  %v324_v20 = vld [vmem:[#allocation2 + $0x190] sm:$0xff]  ;;  %s893_s9 = sshll.u32 %s216_s8, 3 }
  0x53   : > { %s222_s22 = scalar_lea.vmem %s1726_s0, %s894_s30  ;;  %1112 = vmatpush3.bf16.msra.mxu0 %v1111_v9  ;;  %v1143_v17 = vpack.c.bf16 %v307_v12, %v306_v11  ;;  %v325_v21 = vld [vmem:[#allocation2 + $0x198] sm:$0xff]  ;;  %v1115_v24 = vpack.c.bf16 %v277_v19, %v276_v16  ;;  %v308_v26 = vld [vmem:[#allocation2 + $0x110] sm:$0xff]  ;;  %v294_v28 = vld [vmem:[#allocation2 + $0xa0] sm:$0xff]  ;;  %s218_s11 = scalar_lea.vmem [#allocation7], %s893_s9 }
  0x54   : > { %v1643_v2 = vld [vmem:[%s222_s22] sm:$0xff]  ;;  %v1145_v25 = vpack.c.bf16 %v325_v21, %v324_v20  ;;  %v309_v27 = vld [vmem:[#allocation2 + $0x118] sm:$0xff]  ;;  %v295_v29 = vld [vmem:[#allocation2 + $0xa8] sm:$0xff]  ;;  %1142 = vmatprep.subr.bf16.mxu1 %v1141_v13  ;;  %1114 = vmatprep.subr.bf16.mxu0 %v1113_v18  ;;  %v1487_v13 = vmov 6   ;;  %s804_s12 = sshll.u32 %s218_s11, 4  ;;  %s1684_s14 = scalar_lea.hbm %s1730_s4, %s914_s10  ;;  %s1686_s12 = int_to_ptr.vmem [resolvable:$true] %s804_s12 }
  0x55   : > { %233 = vperm.xlu0 %1335, %v1643_v2   ;;  %245 = vperm.xlu1 %1337, %v1643_v2   ;;  %v278_v30 = vld [vmem:[#allocation2 + $0x20] sm:$0xff]  ;;  %v279_v31 = vld [vmem:[#allocation2 + $0x28] sm:$0xff]  ;;  %v1117_v32 = vpack.c.bf16 %v295_v29, %v294_v28  ;;  %v1147_v35 = vpack.c.bf16 %v309_v27, %v308_v26  ;;  %v296_v37 = vld [vmem:[#allocation2 + $0xb0] sm:$0xff]  ;;  %s791_s27 = scalar_lea.sflag [#allocation4], %s216_s8  ;;  %s1404_s30 = scalar_lea.vmem %s1686_s12, 128 }
  0x56   : > { %v326_v33 = vld [vmem:[#allocation2 + $0x1a0] sm:$0xff]  ;;  %v327_v34 = vld [vmem:[#allocation2 + $0x1a8] sm:$0xff]  ;;  %1144 = vmatpush3.bf16.msra.mxu1 %v1143_v17  ;;  %v1119_v36 = vpack.c.bf16 %v279_v31, %v278_v30  ;;  %v297_v38 = vld [vmem:[#allocation2 + $0xb8] sm:$0xff]  ;;  %p1405_p12 = scmp.ne.s32.totalorder %s1686_s12, %s1404_s30  ;;  %p1743_p1 = scmp.ne.s32.totalorder %s1734_s25, 0 }
  0x57   : > { %1116 = vmatpush3.bf16.msra.mxu0 %v1115_v24  ;;  %1146 = vmatprep.subr.bf16.mxu1 %v1145_v25  ;;  %v1149_v39 = vpack.c.bf16 %v327_v34, %v326_v33  ;;  %v310_v40 = vld [vmem:[#allocation2 + $0x120] sm:$0xff]  ;;  %v311_v41 = vld [vmem:[#allocation2 + $0x128] sm:$0xff]  ;;  %v1121_v42 = vpack.c.bf16 %v297_v38, %v296_v37  ;;  %v280_v43 = vld [vmem:[#allocation2 + $0x30] sm:$0xff]  ;;  %s1492_s19 = smov [#allocation7]  }
  0x58   : > { %1118 = vmatprep.subr.bf16.mxu0 %v1117_v32  ;;  %v281_v46 = vld [vmem:[#allocation2 + $0x38] sm:$0xff]  ;;  %v328_v47 = vld [vmem:[#allocation2 + $0x1b0] sm:$0xff]  ;;  %v298_v49 = vld [vmem:[#allocation2 + $0xc0] sm:$0xff]  ;;  %v1151_v51 = vpack.c.bf16 %v311_v41, %v310_v40  ;;  %p1406_p2 = pnand %p1405_p12, %p1743_p1  ;;  %s1408_s6 = sshll.u32 %s1492_s19, 4  ;;  %s1409_s6 = int_to_ptr.vmem [resolvable:$false] %s1408_s6 }
  0x59   : > { %1336 = vset.pattern.permute.xlu0 %v1482_v22  ;;  %1338 = vset.pattern.permute.xlu1 %v1483_v23  ;;  %v329_v48 = vld [vmem:[#allocation2 + $0x1b8] sm:$0xff]  ;;  %v299_v50 = vld [vmem:[#allocation2 + $0xc8] sm:$0xff]  ;;  %v1123_v52 = vpack.c.bf16 %v281_v46, %v280_v43  ;;  %v312_v54 = vld [vmem:[#allocation2 + $0x130] sm:$0xff]  ;;  %s1410_s20 = scalar_lea.vmem %s1409_s6, 256  ;;  %p1411_p4 = scmp.lt.s32.totalorder %s1686_s12, %s1409_s6 }
  0x5a   : > { %227 = vperm.xlu0 %1336, %v1643_v2   ;;  %239 = vperm.xlu1 %1338, %v1643_v2   ;;  %v1153_v53 = vpack.c.bf16 %v329_v48, %v328_v47  ;;  %v313_v55 = vld [vmem:[#allocation2 + $0x138] sm:$0xff]  ;;  %v1125_v56 = vpack.c.bf16 %v299_v50, %v298_v49  ;;  %v282_v57 = vld [vmem:[#allocation2 + $0x40] sm:$0xff]  ;;  %v283_v58 = vld [vmem:[#allocation2 + $0x48] sm:$0xff]  ;;  %v224_v47 = vlaneseq  ;;  %p1407_p3 = pneg %p1406_p2  ;;  %p1412_p7 = scmp.lt.s32.totalorder %s1410_s20, %s1404_s30 }
  0x5b   : > { %1148 = vmatpush3.bf16.msra.mxu1 %v1147_v35  ;;  %1120 = vmatpush3.bf16.msra.mxu0 %v1119_v36  ;;  %v330_v59 = vld [vmem:[#allocation2 + $0x1c0] sm:$0xff]  ;;  %v331_v61 = vld [vmem:[#allocation2 + $0x1c8] sm:$0xff]  ;;  %v300_v62 = vld [vmem:[#allocation2 + $0xd0] sm:$0xff]  ;;  %v1155_v0 = vpack.c.bf16 %v313_v55, %v312_v54  ;;  %v1127_v1 = vpack.c.bf16 %v283_v58, %v282_v57 }
  0x5c   : > { %1150 = vmatprep.subr.bf16.mxu1 %v1149_v39  ;;  %1122 = vmatprep.subr.bf16.mxu0 %v1121_v42  ;;  %v301_v63 = vld [vmem:[#allocation2 + $0xd8] sm:$0xff]  ;;  %v314_v3 = vld [vmem:[#allocation2 + $0x140] sm:$0xff]  ;;  %v315_v4 = vld [vmem:[#allocation2 + $0x148] sm:$0xff]  ;;  %v1157_v6 = vpack.c.bf16 %v331_v61, %v330_v59  ;;  %v1653_v48 = vand.u32 127, %v224_v47  ;;  %p1413_p8 = por %p1412_p7, %p1411_p4 }
  0x5d   : > { %v284_v5 = vld [vmem:[#allocation2 + $0x50] sm:$0xff]  ;;  %v1129_v7 = vpack.c.bf16 %v301_v63, %v300_v62  ;;  %v285_v8 = vld [vmem:[#allocation2 + $0x58] sm:$0xff]  ;;  %v302_v11 = vld [vmem:[#allocation2 + $0xe0] sm:$0xff]  ;;  %v1159_v14 = vpack.c.bf16 %v315_v4, %v314_v3 }
  0x5e   : > { %1339 = vset.pattern.permute.xlu1 %v1484_v44  ;;  %1340 = vset.pattern.permute.xlu0 %v1485_v45  ;;  %v332_v9 = vld [vmem:[#allocation2 + $0x1d0] sm:$0xff]  ;;  %v333_v10 = vld [vmem:[#allocation2 + $0x1d8] sm:$0xff]  ;;  %v303_v12 = vld [vmem:[#allocation2 + $0xe8] sm:$0xff]  ;;  %v1131_v15 = vpack.c.bf16 %v285_v8, %v284_v5  ;;  %p1414_p11 = pnand %p1413_p8, %p1407_p3 }
  0x5f   : > { %257 = vperm.xlu1 %1339, %v1643_v2   ;;  %251 = vperm.xlu0 %1340, %v1643_v2   ;;  %v1161_v16 = vpack.c.bf16 %v333_v10, %v332_v9  ;;  %v316_v17 = vld [vmem:[#allocation2 + $0x150] sm:$0xff]  ;;  %v317_v18 = vld [vmem:[#allocation2 + $0x158] sm:$0xff]  ;;  %v286_v19 = vld [vmem:[#allocation2 + $0x60] sm:$0xff]  ;;  %v1133_v20 = vpack.c.bf16 %v303_v12, %v302_v11 }
  0x60   : > { %1152 = vmatpush3.bf16.msra.mxu1 %v1151_v51  ;;  %1124 = vmatpush3.bf16.msra.mxu0 %v1123_v52  ;;  %v287_v21 = vld [vmem:[#allocation2 + $0x68] sm:$0xff]  ;;  %v334_v22 = vld [vmem:[#allocation2 + $0x1e0] sm:$0xff]  ;;  %v304_v24 = vld [vmem:[#allocation2 + $0xf0] sm:$0xff]  ;;  %v1163_v26 = vpack.c.bf16 %v317_v18, %v316_v17 }
  0x61   : > { %1154 = vmatprep.subr.bf16.mxu1 %v1153_v53  ;;  %1126 = vmatprep.subr.bf16.mxu0 %v1125_v56  ;;  %v335_v23 = vld [vmem:[#allocation2 + $0x1e8] sm:$0xff]  ;;  %v305_v25 = vld [vmem:[#allocation2 + $0xf8] sm:$0xff]  ;;  %v1135_v27 = vpack.c.bf16 %v287_v21, %v286_v19  ;;  %v318_v28 = vld [vmem:[#allocation2 + $0x160] sm:$0xff]  ;;  %v1488_v56 = vmov 1.0  }
  0x62   : > { %v319_v29 = vld [vmem:[#allocation2 + $0x168] sm:$0xff]  ;;  %v288_v30 = vld [vmem:[#allocation2 + $0x70] sm:$0xff]  ;;  %v1137_v31 = vpack.c.bf16 %v305_v25, %v304_v24  ;;  %v289_v32 = vld [vmem:[#allocation2 + $0x78] sm:$0xff] }
  0x63   : > { %1341 = vset.pattern.permute.xlu1 %v1486_v60  ;;  %1343 = vset.pattern.permute.xlu0 %v1486_v60  ;;  %v336_v33 = vld [vmem:[#allocation2 + $0x1f0] sm:$0xff]  ;;  %v337_v34 = vld [vmem:[#allocation2 + $0x1f8] sm:$0xff]  ;;  %v354_v35 = vld [vmem:[#allocation2 + $0x280] sm:$0xff]  ;;  %v1167_v37 = vpack.c.bf16 %v319_v29, %v318_v28  ;;  %v1139_v38 = vpack.c.bf16 %v289_v32, %v288_v30 }
  0x64   : > { %269 = vperm.xlu1 %1341, %v1643_v2   ;;  %1156 = vmatpush3.bf16.msra.mxu1 %v1155_v0  ;;  %v355_v36 = vld [vmem:[#allocation2 + $0x288] sm:$0xff]  ;;  %v1169_v39 = vpack.c.bf16 %v337_v34, %v336_v33  ;;  %v320_v40 = vld [vmem:[#allocation2 + $0x170] sm:$0xff]  ;;  %v321_v41 = vld [vmem:[#allocation2 + $0x178] sm:$0xff] }
  0x65   : > { %1128 = vmatpush3.bf16.msra.mxu0 %v1127_v1  ;;  %1158 = vmatprep.subr.bf16.mxu1 %v1157_v6  ;;  %v1173_v42 = vpack.c.bf16 %v355_v36, %v354_v35  ;;  %v386_v43 = vld [vmem:[#allocation2 + $0x380] sm:$0xff]  ;;  %v387_v44 = vld [vmem:[#allocation2 + $0x388] sm:$0xff]  ;;  %v1171_v45 = vpack.c.bf16 %v321_v41, %v320_v40  ;;  %v356_v55 = vld [vmem:[#allocation2 + $0x290] sm:$0xff] }
  0x66   : > { %1130 = vmatprep.subr.bf16.mxu0 %v1129_v7  ;;  %v1205_v46 = vpack.c.bf16 %v387_v44, %v386_v43  ;;  %v338_v51 = vld [vmem:[#allocation2 + $0x200] sm:$0xff]  ;;  %v339_v52 = vld [vmem:[#allocation2 + $0x208] sm:$0xff]  ;;  %v357_v57 = vld [vmem:[#allocation2 + $0x298] sm:$0xff] }
  0x67   : > { %v370_v53 = vld [vmem:[#allocation2 + $0x300] sm:$0xff]  ;;  %v371_v54 = vld [vmem:[#allocation2 + $0x308] sm:$0xff]  ;;  %v388_v58 = vld [vmem:[#allocation2 + $0x390] sm:$0xff]  ;;  %v1175_v60 = vpack.c.bf16 %v339_v52, %v338_v51  ;;  %v1177_v3 = vpack.c.bf16 %v357_v57, %v356_v55 }
  0x68   : > { %1342 = vset.pattern.permute.xlu1 %v1487_v13  ;;  %1160 = vmatpush3.bf16.msra.mxu1 %v1159_v14  ;;  %v389_v59 = vld [vmem:[#allocation2 + $0x398] sm:$0xff]  ;;  %v1207_v61 = vpack.c.bf16 %v371_v54, %v370_v53  ;;  %v340_v62 = vld [vmem:[#allocation2 + $0x210] sm:$0xff]  ;;  %v358_v7 = vld [vmem:[#allocation2 + $0x2a0] sm:$0xff] }
  0x69   : > { %263 = vperm.xlu1 %1342, %v1643_v2   ;;  %1132 = vmatpush3.bf16.msra.mxu0 %v1131_v15  ;;  %v1165_v2 = vpack.c.bf16 %v335_v23, %v334_v22  ;;  %v341_v63 = vld [vmem:[#allocation2 + $0x218] sm:$0xff]  ;;  %v1209_v4 = vpack.c.bf16 %v389_v59, %v388_v58  ;;  %v372_v5 = vld [vmem:[#allocation2 + $0x310] sm:$0xff]  ;;  %v359_v8 = vld [vmem:[#allocation2 + $0x2a8] sm:$0xff] }
  0x6a   : > { %1162 = vmatprep.subr.bf16.mxu1 %v1161_v16  ;;  %1134 = vmatprep.subr.bf16.mxu0 %v1133_v20  ;;  %v373_v6 = vld [vmem:[#allocation2 + $0x318] sm:$0xff]  ;;  %v390_v9 = vld [vmem:[#allocation2 + $0x3a0] sm:$0xff]  ;;  %v391_v10 = vld [vmem:[#allocation2 + $0x3a8] sm:$0xff]  ;;  %v1179_v11 = vpack.c.bf16 %v341_v63, %v340_v62  ;;  %v1181_v15 = vpack.c.bf16 %v359_v8, %v358_v7 }
  0x6b   : > { %v1211_v12 = vpack.c.bf16 %v373_v6, %v372_v5  ;;  %v342_v13 = vld [vmem:[#allocation2 + $0x220] sm:$0xff]  ;;  %v343_v14 = vld [vmem:[#allocation2 + $0x228] sm:$0xff]  ;;  %v1213_v16 = vpack.c.bf16 %v391_v10, %v390_v9  ;;  %v360_v19 = vld [vmem:[#allocation2 + $0x2b0] sm:$0xff] }
  0x6c   : > { %1164 = vmatpush3.bf16.msra.mxu1 %v1163_v26  ;;  %v374_v17 = vld [vmem:[#allocation2 + $0x320] sm:$0xff]  ;;  %v375_v18 = vld [vmem:[#allocation2 + $0x328] sm:$0xff]  ;;  %v361_v20 = vld [vmem:[#allocation2 + $0x2b8] sm:$0xff]  ;;  %v1183_v24 = vpack.c.bf16 %v343_v14, %v342_v13 }
  0x6d   : > { %1136 = vmatpush3.bf16.msra.mxu0 %v1135_v27  ;;  %1166 = vmatprep.subr.bf16.mxu1 %v1165_v2  ;;  %v392_v21 = vld [vmem:[#allocation2 + $0x3b0] sm:$0xff]  ;;  %v393_v22 = vld [vmem:[#allocation2 + $0x3b8] sm:$0xff]  ;;  %v1215_v25 = vpack.c.bf16 %v375_v18, %v374_v17  ;;  %v1185_v2 = vpack.c.bf16 %v361_v20, %v360_v19  ;;  %v363_v32 = vld [vmem:[#allocation2 + $0x2c8] sm:$0xff] }
  0x6e   : > { %1138 = vmatprep.subr.bf16.mxu0 %v1137_v31  ;;  %v344_v26 = vld [vmem:[#allocation2 + $0x230] sm:$0xff]  ;;  %v345_v27 = vld [vmem:[#allocation2 + $0x238] sm:$0xff]  ;;  %v1217_v28 = vpack.c.bf16 %v393_v22, %v392_v21  ;;  %v362_v31 = vld [vmem:[#allocation2 + $0x2c0] sm:$0xff] }
  0x6f   : > { %v376_v29 = vld [vmem:[#allocation2 + $0x330] sm:$0xff]  ;;  %v377_v30 = vld [vmem:[#allocation2 + $0x338] sm:$0xff]  ;;  %v394_v33 = vld [vmem:[#allocation2 + $0x3c0] sm:$0xff]  ;;  %v1187_v36 = vpack.c.bf16 %v345_v27, %v344_v26  ;;  %v1189_v40 = vpack.c.bf16 %v363_v32, %v362_v31  ;;  %v1489_v26 = vmov 0.0|0.0  }
  0x70   : > { %1168 = vmatpush3.bf16.msra.mxu1 %v1167_v37  ;;  %v395_v34 = vld [vmem:[#allocation2 + $0x3c8] sm:$0xff]  ;;  %v1219_v37 = vpack.c.bf16 %v377_v30, %v376_v29  ;;  %v364_v44 = vld [vmem:[#allocation2 + $0x2d0] sm:$0xff]  ;;  %v397_v47 = vld [vmem:[#allocation2 + $0x3d8] sm:$0xff] }
  0x71   : > { %1140 = vmatpush3.bf16.msra.mxu0 %v1139_v38  ;;  %1170 = vmatprep.subr.bf16.mxu1 %v1169_v39  ;;  %v346_v38 = vld [vmem:[#allocation2 + $0x240] sm:$0xff]  ;;  %v347_v39 = vld [vmem:[#allocation2 + $0x248] sm:$0xff]  ;;  %v1221_v41 = vpack.c.bf16 %v395_v34, %v394_v33  ;;  %v348_v51 = vld [vmem:[#allocation2 + $0x250] sm:$0xff] }
  0x72   : > { %1174 = vmatprep.subr.bf16.mxu0 %v1173_v42  ;;  %v378_v42 = vld [vmem:[#allocation2 + $0x340] sm:$0xff]  ;;  %v379_v43 = vld [vmem:[#allocation2 + $0x348] sm:$0xff]  ;;  %v349_v52 = vld [vmem:[#allocation2 + $0x258] sm:$0xff] }
  0x73   : > { %v380_v55 = vld [vmem:[#allocation2 + $0x350] sm:$0xff]  ;;  %v381_v57 = vld [vmem:[#allocation2 + $0x358] sm:$0xff]  ;;  %v366_v58 = vld [vmem:[#allocation2 + $0x2e0] sm:$0xff]  ;;  %v1195_v62 = vpack.c.bf16 %v349_v52, %v348_v51 }
  0x74   : > { %1172 = vmatpush3.bf16.msra.mxu1 %v1171_v45  ;;  %v365_v45 = vld [vmem:[#allocation2 + $0x2d8] sm:$0xff]  ;;  %v367_v59 = vld [vmem:[#allocation2 + $0x2e8] sm:$0xff]  ;;  %v1227_v63 = vpack.c.bf16 %v381_v57, %v380_v55  ;;  %v382_v5 = vld [vmem:[#allocation2 + $0x360] sm:$0xff] }
  0x75   : > { %1206 = vmatprep.subr.bf16.mxu1 %v1205_v46  ;;  %v396_v46 = vld [vmem:[#allocation2 + $0x3d0] sm:$0xff]  ;;  %v1193_v53 = vpack.c.bf16 %v365_v45, %v364_v44  ;;  %v383_v6 = vld [vmem:[#allocation2 + $0x368] sm:$0xff]  ;;  %v369_v8 = vld [vmem:[#allocation2 + $0x2f8] sm:$0xff]  ;;  %v1491_v45 = vmov 0.0  }
  0x76   : > { %v1225_v54 = vpack.c.bf16 %v397_v47, %v396_v46  ;;  %v368_v7 = vld [vmem:[#allocation2 + $0x2f0] sm:$0xff]  ;;  %v401_v10 = vld [vmem:[#allocation2 + $0x3f8] sm:$0xff]  ;;  %v692_v29 = vld [vmem:[#allocation5 + $0x20] sm:$0xff] }
  0x77   : > { %v400_v9 = vld [vmem:[#allocation2 + $0x3f0] sm:$0xff]  ;;  %v1201_v14 = vpack.c.bf16 %v369_v8, %v368_v7  ;;  %v385_v18 = vld [vmem:[#allocation2 + $0x378] sm:$0xff]  ;;  %v693_v30 = vld [vmem:[#allocation5 + $0x28] sm:$0xff] }
  0x78   : > { %v352_v13 = vld [vmem:[#allocation2 + $0x270] sm:$0xff]  ;;  %v1244_v31 = vpack.c.bf16 %v693_v30, %v692_v29  ;;  %v695_v32 = vld [vmem:[#allocation5 + $0x38] sm:$0xff]  ;;  %v697_v34 = vld [vmem:[#allocation5 + $0x48] sm:$0xff] }
  0x79   : > { %v384_v17 = vld [vmem:[#allocation2 + $0x370] sm:$0xff] }
  0x7a   : > { %v1235_v20 = vpack.c.bf16 %v385_v18, %v384_v17 }
  0xd4   : > { %v234_v49 = vpop.permute.xlu0 %233  ;;  %v246_v50 = vpop.permute.xlu1 %245 }
  0xd5   : > { %vm235_vm0 = vcmp.eq.s32.totalorder %v1653_v48, %v234_v49  ;;  %vm247_vm1 = vcmp.eq.s32.totalorder %v1653_v48, %v246_v50  ;;  %v1191_v49 = vpack.c.bf16 %v347_v39, %v346_v38  ;;  %v1223_v50 = vpack.c.bf16 %v379_v43, %v378_v42  ;;  %v700_v39 = vld [vmem:[#allocation5 + $0x60] sm:$0xff]  ;;  %v702_v42 = vld [vmem:[#allocation5 + $0x70] sm:$0xff]  ;;  %v703_v43 = vld [vmem:[#allocation5 + $0x78] sm:$0xff] }
  0xd6   : > { %904 = vmatprep.mubr.msk.f32.mxu0 %vm235_vm0, %v1488_v56  ;;  %906 = vmatprep.mubr.msk.f32.mxu1 %vm247_vm1, %v1488_v56  ;;  %v1259_v44 = vpack.c.bf16 %v703_v43, %v702_v42 }
  0xd9   : > { %v228_v0 = vpop.permute.xlu0 %227  ;;  %v240_v1 = vpop.permute.xlu1 %239 }
  0xda   : > { %vm229_vm2 = vcmp.eq.s32.totalorder %v1653_v48, %v228_v0  ;;  %vm241_vm3 = vcmp.eq.s32.totalorder %v1653_v48, %v240_v1  ;;  %v350_v0 = vld [vmem:[#allocation2 + $0x260] sm:$0xff]  ;;  %v351_v1 = vld [vmem:[#allocation2 + $0x268] sm:$0xff] }
  0xdb   : > { %905 = vmatmul.mubr.msk.f32.vlgmr.msra.gmra.mrb[0].mxu0 %vm229_vm2, %v1488_v56  ;;  %907 = vmatmul.mubr.msk.f32.vlgmr.msra.gmra.mrb[0].mxu1 %vm241_vm3, %v1488_v56 }
  0xdc   : > { %1176 = vmatpush3.bf16.msra.mxu0 %v1175_v60  ;;  %1208 = vmatpush3.bf16.msra.mxu1 %v1207_v61  ;;  %v398_v60 = vld [vmem:[#allocation2 + $0x3e0] sm:$0xff]  ;;  %v399_v61 = vld [vmem:[#allocation2 + $0x3e8] sm:$0xff] }
  0xdd   : > { %1178 = vmatprep.subr.bf16.mxu0 %v1177_v3  ;;  %1210 = vmatprep.subr.bf16.mxu1 %v1209_v4  ;;  %v1197_v3 = vpack.c.bf16 %v367_v59, %v366_v58  ;;  %v1229_v4 = vpack.c.bf16 %v399_v61, %v398_v60 }
  0xde   : > { %v258_v23 = vpop.permute.xlu1 %257  ;;  %v252_v21 = vpop.permute.xlu0 %251 }
  0xdf   : > { %vm259_vm4 = vcmp.eq.s32.totalorder %v1653_v48, %v258_v23  ;;  %vm253_vm6 = vcmp.eq.s32.totalorder %v1653_v48, %v252_v21  ;;  %v688_v23 = vld [vmem:[#allocation5] sm:$0xff] }
  0xe0   : > { %1180 = vmatpush3.bf16.msra.mxu0 %v1179_v11  ;;  %1212 = vmatpush3.bf16.msra.mxu1 %v1211_v12  ;;  %v1199_v11 = vpack.c.bf16 %v351_v1, %v350_v0  ;;  %v1231_v12 = vpack.c.bf16 %v383_v6, %v382_v5 }
  0xe1   : > { %1182 = vmatprep.subr.bf16.mxu0 %v1181_v15  ;;  %1214 = vmatprep.subr.bf16.mxu1 %v1213_v16  ;;  %v353_v15 = vld [vmem:[#allocation2 + $0x278] sm:$0xff]  ;;  %v1233_v16 = vpack.c.bf16 %v401_v10, %v400_v9 }
  0xe2   : > { %908 = vmatprep.mubr.msk.f32.mxu0 %vm259_vm4, %v1488_v56  ;;  %v1203_v19 = vpack.c.bf16 %v353_v15, %v352_v13 }
  0xe3   : > { %v270_v35 = vpop.permute.xlu1 %269 }
  0xe4   : > { %1184 = vmatpush3.bf16.msra.mxu0 %v1183_v24  ;;  %1216 = vmatpush3.bf16.msra.mxu1 %v1215_v25  ;;  %vm271_vm5 = vcmp.eq.s32.totalorder %v1653_v48, %v270_v35  ;;  %v689_v24 = vld [vmem:[#allocation5 + $0x8] sm:$0xff]  ;;  %v690_v25 = vld [vmem:[#allocation5 + $0x10] sm:$0xff] }
  0xe5   : > { %1186 = vmatprep.subr.bf16.mxu0 %v1185_v2  ;;  %1218 = vmatprep.subr.bf16.mxu1 %v1217_v28  ;;  %v1238_v27 = vpack.c.bf16 %v689_v24, %v688_v23  ;;  %v691_v2 = vld [vmem:[#allocation5 + $0x18] sm:$0xff] }
  0xe6   : > { %910 = vmatprep.mubr.msk.f32.mxu1 %vm271_vm5, %v1488_v56  ;;  %v1241_v28 = vpack.c.bf16 %v691_v2, %v690_v25 }
  0xe8   : > { %1188 = vmatpush3.bf16.msra.mxu0 %v1187_v36  ;;  %1220 = vmatpush3.bf16.msra.mxu1 %v1219_v37  ;;  %v264_v22 = vpop.permute.xlu1 %263  ;;  %v698_v36 = vld [vmem:[#allocation5 + $0x50] sm:$0xff]  ;;  %v699_v37 = vld [vmem:[#allocation5 + $0x58] sm:$0xff] }
  0xe9   : > { %1190 = vmatprep.subr.bf16.mxu0 %v1189_v40  ;;  %1222 = vmatprep.subr.bf16.mxu1 %v1221_v41  ;;  %vm265_vm7 = vcmp.eq.s32.totalorder %v1653_v48, %v264_v22  ;;  %v694_v48 = vld [vmem:[#allocation5 + $0x30] sm:$0xff]  ;;  %v1253_v38 = vpack.c.bf16 %v699_v37, %v698_v36  ;;  %v701_v40 = vld [vmem:[#allocation5 + $0x68] sm:$0xff] }
  0xea   : > { %v1247_v33 = vpack.c.bf16 %v695_v32, %v694_v48  ;;  %v1256_v41 = vpack.c.bf16 %v701_v40, %v700_v39 }
  0xec   : > { %1192 = vmatpush3.bf16.msra.mxu0 %v1191_v49  ;;  %1224 = vmatpush3.bf16.msra.mxu1 %v1223_v50  ;;  %v903_v49 = vld [vmem:[%s1728_s2] ss:$0 sm:$0xff] }
  0xed   : > { %1194 = vmatprep.subr.bf16.mxu0 %v1193_v53  ;;  %1226 = vmatprep.subr.bf16.mxu1 %v1225_v54 }
  0xf0   : > { %1196 = vmatpush3.bf16.msra.mxu0 %v1195_v62  ;;  %1228 = vmatpush3.bf16.msra.mxu1 %v1227_v63 }
  0xf1   : > { %1198 = vmatprep.subr.bf16.mxu0 %v1197_v3  ;;  %1230 = vmatprep.subr.bf16.mxu1 %v1229_v4  ;;  %v912_v3 = vld [vmem:[%s1728_s2 + $0x1] ss:$0 sm:$0xff] }
  0xf4   : > { %1200 = vmatpush3.bf16.msra.mxu0 %v1199_v11  ;;  %1232 = vmatpush3.bf16.msra.mxu1 %v1231_v12 }
  0xf5   : > { %1202 = vmatprep.subr.bf16.mxu0 %v1201_v14  ;;  %1234 = vmatprep.subr.bf16.mxu1 %v1233_v16 }
  0xf8   : > { %1204 = vmatpush3.bf16.msra.mxu0 %v1203_v19  ;;  %1236 = vmatpush3.bf16.msra.mxu1 %v1235_v20 }
  0xf9   : > { %1237 = vmatprep.subr.bf16.mxu0 %v1489_v26 }
  0xfb   : > { %909 = vmatmul.mubr.msk.f32.vlgmr.msra.gmra.mrb[2].mxu0 %vm253_vm6, %v1488_v56  ;;  %911 = vmatmul.mubr.msk.f32.vlgmr.msra.gmra.mrb[2].mxu1 %vm265_vm7, %v1488_v56  ;;  %v696_v56 = vld [vmem:[#allocation5 + $0x40] sm:$0xff] }
  0xfc   : > { %1239 = vmatpush3.bf16.msra.mxu0 %v1238_v27  ;;  %v1250_v35 = vpack.c.bf16 %v697_v34, %v696_v56  ;;  %1106 = vmatprep.mubr.msk.f32.mxu0 %vm1490_vm8, %v1491_v45 }
  0xfd   : > { %1240 = vmatprep.subr.bf16.mxu0 %v1489_v26 }
 0x100   : > { %1242 = vmatpush3.bf16.msra.mxu0 %v1241_v28 }
 0x101   : > { %1243 = vmatprep.subr.bf16.mxu0 %v1489_v26 }
 0x104   : > { %1245 = vmatpush3.bf16.msra.mxu0 %v1244_v31 }
 0x105   : > { %1246 = vmatprep.subr.bf16.mxu0 %v1489_v26 }
 0x108   : > { %1248 = vmatpush3.bf16.msra.mxu0 %v1247_v33 }
 0x109   : > { %1249 = vmatprep.subr.bf16.mxu0 %v1489_v26 }
 0x10c   : > { %1251 = vmatpush3.bf16.msra.mxu0 %v1250_v35 }
 0x10d   : > { %1252 = vmatprep.subr.bf16.mxu0 %v1489_v26 }
 0x110   : > { %1254 = vmatpush3.bf16.msra.mxu0 %v1253_v38 }
 0x111   : > { %1255 = vmatprep.subr.bf16.mxu0 %v1489_v26 }
 0x114   : > { %1257 = vmatpush3.bf16.msra.mxu0 %v1256_v41 }
 0x115   : > { %1258 = vmatprep.subr.bf16.mxu0 %v1489_v26 }
 0x118   : > { %1260 = vmatpush3.bf16.msra.mxu0 %v1259_v44 }
 0x1ae   : > { %v949_v46 = vpop.f32.mrb[0].mxu0  ;;  %v984_v47 = vpop.f32.mrb[0].mxu1 }
 0x1af   : > { %v950_v50 = vpop.f32.mrb[1].mxu0  ;;  %v985_v51 = vpop.f32.mrb[1].mxu1 }
 0x1b0   : > { %v951_v52 = vadd.f32 %v950_v50, %v949_v46  ;;  %v986_v53 = vadd.f32 %v985_v51, %v984_v47 }
 0x1b2   : > { %v474_v54 = vadd.f32 %v951_v52, %v903_v49 }
 0x1b4   : > { %v544_v55 = vadd.f32 %v986_v53, %v474_v54 }
 0x1ce   : > { %v1019_v57 = vpop.f32.mrb[2].mxu0  ;;  %v1054_v58 = vpop.f32.mrb[2].mxu1 }
 0x1cf   : > { %v1020_v59 = vpop.f32.mrb[3].mxu0  ;;  %v1055_v60 = vpop.f32.mrb[3].mxu1 }
 0x1d0   : > { %v1021_v61 = vadd.f32 %v1020_v59, %v1019_v57  ;;  %v1056_v62 = vadd.f32 %v1055_v60, %v1054_v58 }
 0x1d2   : > { %v614_v63 = vadd.f32 %v1021_v61, %v544_v55 }
 0x1d4   : > { %v684_v0 = vadd.f32 %v1056_v62, %v614_v63 }
 0x1d6   : > { %v687_v1 = vmax.f32 %v684_v0, 0.0 }
 0x1d8   : > { %1107 = vmatmul.mubr.f32.vlgmr.msra.gmra.mrb[4].mxu0 %v687_v1 }
 0x2ab   : > { %v775_v4 = vpop.f32.mrb[4].mxu0 }
 0x2ac   : > { %v776_v5 = vadd.f32 %v912_v3, %v775_v4  ;;  %v1108_v6 = vpop.f32.mrb[5].mxu0 }
 0x2ae   : > { %779 = vmax.xlane.f32.xlu0 %v776_v5 }
 0x33b   : > { %v780_v7 = vpop.xlane.xlu0 %779 }
 0x33c   : > { %v781_v8 = vsub.f32 %v776_v5, %v780_v7 }
 0x33e   : > { %v782_v9 = vmul.f32 1.442695, %v781_v8 }
 0x340   : > { %1344 = vpow2.f32 %v782_v9 }
 0x34a   : > { %v1345_v10 = vpop.eup %1344 }
 0x34b   : > { %784 = vadd.xlane.f32.xlu1 %v1345_v10 }
 0x3d8   : > { %v785_v11 = vpop.xlane.xlu1 %784 }
 0x3d9   : > { %1346 = vlog2.f32 %v785_v11 }
 0x3e3   : > { %v1347_v12 = vpop.eup %1346 }
 0x3e4   : > { %v787_v13 = vmul.f32 0.6931472, %v1347_v12 }
 0x3e6   : > { %v788_v14 = vsub.f32 %v781_v8, %v787_v13 }
 0x3e8   : > { %789 = vst [vmem:[%s218_s11] sm:$0xff] %v788_v14 }
 0x3e9   : > { %1417 = shalt.err (!%p1414_p11)
}
 0x3ea   : > { %s1418_s22 = scalar_lea.hbm %s1684_s14, 128  ;;  %s1422_s5 = scalar_lea.hbm %s1730_s4, 512 }
 0x3eb   : > { %p1419_p13 = scmp.ne.s32.totalorder %s1684_s14, %s1418_s22  ;;  %p1423_p6 = scmp.lt.u32.totalorder %s1684_s14, %s1730_s4 }
 0x3ec   : > { %p1424_p9 = scmp.lt.u32.totalorder %s1422_s5, %s1418_s22  ;;  %p1426_p12 = scmp.lt.u32.totalorder %s1418_s22, %s1684_s14 }
 0x3ed   : > { %p1420_p5 = pnand %p1419_p13, %p1743_p1 }
 0x3ee   : > { %p1425_p10 = por %p1424_p9, %p1423_p6 }
 0x3ef   : > { %p1421_p0 = pneg %p1420_p5 }
 0x3f0   : > { %p1427_p2 = por %p1426_p12, %p1425_p10 }
 0x3f2   : > { %p1428_p3 = pnand %p1427_p2, %p1421_p0 }
 0x3f4   : > { %1431 = shalt.err (!%p1428_p3)
}
 0x3f5   : > { %1269 = dma.vmem_to_hbm [thread:$0]  (%p1743_p1), %s1686_s12, 128, %s1684_s14, %s791_s27  }
 0x3f6 PF: > { %p1286_p4 = scmp.ge.s32.totalorder %s1474_s18, 2  ;;  %s816_s9 = sand.u32 1, %s1462_s15  }
 0x3f7   : > { %p1744_p7 = scmp.ne.s32.totalorder %s1735_s26, 0  ;;  %s817_s10 = scalar_lea.sflag [#allocation4], %s816_s9 }
 0x3f9   : > { %p1279_p8 = pnand %p1286_p4, %p1744_p7 }
 0x3fb   : > { %1457 = dma.done.wait (!%p1279_p8), %s817_s10, 128  }
 0x3fc   : > { %1459 = vsyncadd (!%p1279_p8), %s817_s10, 4294967168  ;;  %p16_p11 = scmp.ge.s32.totalorder %s1543_s21, 6   ;;  %s1745_s15 = smov %s1466_s16 }
 0x3fd   : > { %s1746_s16 = smov %s1470_s17  ;;  %s1747_s17 = smov %s1554_s24 }
 0x3fe   : > { %s1748_s18 = smov %s1543_s21  ;;  %18 = sbr.rel (!%p16_p11) target bundleno = 5 (0x5), region = 80 }
 0x405   :  { %822 = vsyncpa [#allocation3], 1 }
 0x406   :  { %824 = vsyncpa [#allocation3 + $0x1], 1 }
 0x407   :  { %825 = vsyncpa [#allocation6], 1 }
 0x408   :  { %826 = vsyncpa [#allocation4], 1 }
 0x409   :  { %828 = vsyncpa [#allocation4 + $0x1], 1 }

</bundles_post_ra>
